<compile_context>
chip_gen: v6e
topology: v6e:2x2x1
jax: 0.10.0
libtpu: 0.0.40
codegen_flags: <defaults>
</compile_context>

<pallas_src>
import jax
import jax.numpy as jnp
from jax.experimental import pallas as pl
from jax.experimental.pallas import tpu as pltpu

LANES = 128
SUBLANES = 8


def _round_up(x, m):
    return ((x + m - 1) // m) * m


def _make_kernel(tile_rows):
    """Builds the fused streaming-reduction kernel for a given tile height."""
    num_slabs = tile_rows // SUBLANES

    def kernel(count_ref, p_ref, t_ref, out_ref):
        step = pl.program_id(0)

        @pl.when(step == 0)
        def _():
            out_ref[...] = jnp.zeros_like(out_ref)

        n_valid = count_ref[0]                       # true element count
        base = step * (tile_rows * LANES)            # first element of tile

        # (8,128) element-offset iota within one slab (hoisted out of loop).
        sub = jax.lax.broadcasted_iota(jnp.int32, (SUBLANES, LANES), 0)
        lane = jax.lax.broadcasted_iota(jnp.int32, (SUBLANES, LANES), 1)
        slab_iota = sub * LANES + lane               # 0 .. 1023

        def body(s, carry):
            bce_acc, inter_acc, psum_acc = carry
            r0 = pl.multiple_of(s * SUBLANES, SUBLANES)
            p = p_ref[pl.ds(r0, SUBLANES), :].astype(jnp.float32)
            t = t_ref[pl.ds(r0, SUBLANES), :].astype(jnp.float32)

            # Mask BEFORE the logs/multiplies: the ragged tail block's
            # contents are unspecified (could be NaN/Inf).
            idx = base + s * (SUBLANES * LANES) + slab_iota
            valid = idx < n_valid
            p = jnp.where(valid, p, 0.0)
            t = jnp.where(valid, t, 0.0)

            # PyTorch BCELoss clamps the log terms at -100, so a masked
            # (p=0, t=0) element contributes exactly 0 to every sum.
            log_p = jnp.maximum(jnp.log(p), -100.0)
            log_1mp = jnp.maximum(jnp.log(1.0 - p), -100.0)
            bce = -(t * (log_p - log_1mp) + log_1mp)

            return (bce_acc + bce, inter_acc + p * t, psum_acc + (p + t))

        zeros = jnp.zeros((SUBLANES, LANES), jnp.float32)
        bce_acc, inter_acc, psum_acc = jax.lax.fori_loop(
            0, num_slabs, body, (zeros, zeros, zeros),
            unroll=min(8, num_slabs))

        # Output block index is constant across the grid axis -> resident
        # accumulator; written back to HBM once at the end.
        out_ref[0:SUBLANES, :] += bce_acc
        out_ref[SUBLANES:2 * SUBLANES, :] += inter_acc
        out_ref[2 * SUBLANES:3 * SUBLANES, :] += psum_acc

    return kernel


def fraud_loss(prediction, target, *, tile_rows=2048):
    """BCELoss(prediction, target) + DiceLoss(prediction, target) (smooth=1).

    prediction, target: arrays of identical shape (e.g. NCHW); prediction
    must lie in [0, 1] as required by torch.nn.BCELoss.
    """
    assert prediction.shape == target.shape
    n = prediction.size

    flat_p = prediction.reshape(-1)
    flat_t = target.reshape(-1)

    rows = pl.cdiv(n, LANES)
    rem = n % LANES
    if rem:
        # Rare path: only when the element count is not lane-aligned, and
        # only to the next multiple of 128 (the kernel masks the tail anyway).
        pad = LANES - rem
        flat_p = jnp.pad(flat_p, (0, pad))
        flat_t = jnp.pad(flat_t, (0, pad))
    p2d = flat_p.reshape(rows, LANES)
    t2d = flat_t.reshape(rows, LANES)

    # Shrink the tile for tiny inputs; keep it a multiple of 8 sublanes.
    tile_rows = max(SUBLANES, min(tile_rows, _round_up(rows, SUBLANES)))
    tile_rows = _round_up(tile_rows, SUBLANES)
    steps = pl.cdiv(rows, tile_rows)

    count = jnp.array([n], dtype=jnp.int32)   # true element count -> SMEM

    in_bytes = (p2d.size * p2d.dtype.itemsize
                + t2d.size * t2d.dtype.itemsize)

    partials = pl.pallas_call(
        _make_kernel(tile_rows),
        out_shape=jax.ShapeDtypeStruct((3 * SUBLANES, LANES), jnp.float32),
        grid_spec=pltpu.PrefetchScalarGridSpec(
            num_scalar_prefetch=1,
            grid=(steps,),
            in_specs=[
                pl.BlockSpec((tile_rows, LANES), lambda i, n_ref: (i, 0)),
                pl.BlockSpec((tile_rows, LANES), lambda i, n_ref: (i, 0)),
            ],
            out_specs=pl.BlockSpec((3 * SUBLANES, LANES),
                                   lambda i, n_ref: (0, 0)),
        ),
        compiler_params=pltpu.CompilerParams(
            dimension_semantics=("arbitrary",),
        ),
        cost_estimate=pl.CostEstimate(
            flops=10 * rows * LANES,
            transcendentals=2 * rows * LANES,
            bytes_accessed=in_bytes,
        ),
    )(count, p2d, t2d)

    # Trivial finalize in JAX on the tiny (24,128) partials.
    partials = partials.reshape(3, SUBLANES, LANES)
    totals = jnp.sum(partials, axis=(1, 2))            # (3,) f32
    bce_mean = totals[0] / jnp.float32(n)
    dice = (2.0 * totals[1] + 1.0) / (totals[2] + 1.0)  # totals[2]=sum(p)+sum(t)
    return bce_mean + (1.0 - dice)


def fraud_loss_reference(prediction, target):
    p = prediction.astype(jnp.float32)
    t = target.astype(jnp.float32)
    log_p = jnp.maximum(jnp.log(p), -100.0)
    log_1mp = jnp.maximum(jnp.log(1.0 - p), -100.0)
    bce = jnp.mean(-(t * log_p + (1.0 - t) * log_1mp))
    inter = jnp.sum(p * t)
    union = jnp.sum(p) + jnp.sum(t) + 1.0
    dice = (2.0 * inter + 1.0) / union
    return bce + (1.0 - dice)


if __name__ == "__main__":
    key = jax.random.PRNGKey(0)
    k1, k2 = jax.random.split(key)

    # Small NCHW-shaped inputs: batch=2, channels=4, spatial=16x16.
    shape = (2, 4, 16, 16)
    # prediction must lie in (0, 1) for BCELoss -> sigmoid of a normal.
    prediction = jax.nn.sigmoid(jax.random.normal(k1, shape, dtype=jnp.float32))
    target = (jax.random.uniform(k2, shape) > 0.5).astype(jnp.float32)

    loss = jax.block_until_ready(fraud_loss(prediction, target))
    ref = fraud_loss_reference(prediction, target)
    assert jnp.allclose(loss, ref, rtol=1e-5, atol=1e-5), (loss, ref)

    # Non-lane-aligned element count exercises the in-kernel tail mask.
    shape2 = (3, 5, 7, 11)   # 1155 elements, not a multiple of 128
    k3, k4 = jax.random.split(k2)
    prediction2 = jax.nn.sigmoid(jax.random.normal(k3, shape2, dtype=jnp.float32))
    target2 = (jax.random.uniform(k4, shape2) > 0.5).astype(jnp.float32)
    loss2 = jax.block_until_ready(fraud_loss(prediction2, target2))
    ref2 = fraud_loss_reference(prediction2, target2)
    assert jnp.allclose(loss2, ref2, rtol=1e-5, atol=1e-5), (loss2, ref2)

    print("KERNEL_OK")
</pallas_src>

<mosaic_0001>
module attributes {stable_mosaic.version = 11 : i64} {
  func.func @kernel(%arg0: i32, %arg1: memref<1xi32, #tpu.memory_space<smem>>, %arg2: memref<16x128xf32, #tpu.memory_space<vmem>>, %arg3: memref<16x128xf32, #tpu.memory_space<vmem>>, %arg4: memref<24x128xf32, #tpu.memory_space<vmem>>) attributes {dimension_semantics = [#tpu.dimension_semantics<arbitrary>], iteration_bounds = array<i64: 1>, scalar_prefetch = 1 : i64, scratch_operands = 0 : i64, tpu.core_type = #tpu.core_type<tc>, window_params = [{transform_indices = @transform_0, window_bounds = array<i64: 16, 128>}, {transform_indices = @transform_1, window_bounds = array<i64: 16, 128>}, {pipeline_mode = #tpu.pipeline_mode<synchronous>, transform_indices = @transform_2, window_bounds = array<i64: 24, 128>}]} {
    %c0_i32 = arith.constant 0 : i32
    %0 = arith.cmpi eq, %arg0, %c0_i32 : i32
    %1 = arith.extui %0 : i1 to i32
    %c0_i32_0 = arith.constant 0 : i32
    %2 = arith.cmpi ne, %1, %c0_i32_0 : i32
    scf.if %2 {
      %cst_30 = arith.constant 0.000000e+00 : f32
      %88 = vector.broadcast %cst_30 : f32 to vector<24x128xf32>
      %c0_31 = arith.constant 0 : index
      %c0_32 = arith.constant 0 : index
      %89 = vector.load %arg4[%c0_31, %c0_32] : memref<24x128xf32, #tpu.memory_space<vmem>>, vector<24x128xf32>
      tpu.vector_store %arg4[%c0_31, %c0_32], %88 {strides = array<i32>} : memref<24x128xf32, #tpu.memory_space<vmem>>, vector<24x128xf32>,
    } else {
    }
    %c0 = arith.constant 0 : index
    %3 = memref.load %arg1[%c0] : memref<1xi32, #tpu.memory_space<smem>>
    %c2048_i32 = arith.constant 2048 : i32
    %4 = arith.muli %arg0, %c2048_i32 : i32
    %5 = tpu.iota {dimensions = array<i32: 0>} : vector<8x128xi32>
    %6 = tpu.iota {dimensions = array<i32: 1>} : vector<8x128xi32>
    %c128_i32 = arith.constant 128 : i32
    %7 = vector.broadcast %c128_i32 : i32 to vector<8x128xi32>
    %8 = arith.muli %5, %7 : vector<8x128xi32>
    %9 = arith.addi %8, %6 : vector<8x128xi32>
    %cst = arith.constant 0.000000e+00 : f32
    %10 = vector.broadcast %cst : f32 to vector<8x128xf32>
    %c0_i32_1 = arith.constant 0 : i32
    %c8_i32 = arith.constant 8 : i32
    %11 = arith.muli %c0_i32_1, %c8_i32 : i32
    %12 = tpu.assume_multiple %11, 8 : i32
    %13 = arith.index_cast %12 : i32 to index
    %c0_2 = arith.constant 0 : index
    %14 = vector.load %arg2[%13, %c0_2] : memref<16x128xf32, #tpu.memory_space<vmem>>, vector<8x128xf32>
    %15 = arith.index_cast %12 : i32 to index
    %c0_3 = arith.constant 0 : index
    %16 = vector.load %arg3[%15, %c0_3] : memref<16x128xf32, #tpu.memory_space<vmem>>, vector<8x128xf32>
    %c1024_i32 = arith.constant 1024 : i32
    %17 = arith.muli %c0_i32_1, %c1024_i32 : i32
    %18 = arith.addi %4, %17 : i32
    %19 = vector.broadcast %18 : i32 to vector<8x128xi32>
    %20 = arith.addi %19, %9 : vector<8x128xi32>
    %21 = vector.broadcast %3 : i32 to vector<8x128xi32>
    %22 = arith.cmpi slt, %20, %21 : vector<8x128xi32>
    %cst_4 = arith.constant 0.000000e+00 : f32
    %23 = vector.broadcast %cst_4 : f32 to vector<8x128xf32>
    %24 = arith.select %22, %14, %23 : vector<8x128xi1>, vector<8x128xf32>
    %cst_5 = arith.constant 0.000000e+00 : f32
    %25 = vector.broadcast %cst_5 : f32 to vector<8x128xf32>
    %26 = arith.select %22, %16, %25 : vector<8x128xi1>, vector<8x128xf32>
    %27 = math.log %24 : vector<8x128xf32>
    %cst_6 = arith.constant -1.000000e+02 : f32
    %28 = vector.broadcast %cst_6 : f32 to vector<8x128xf32>
    %29 = arith.maximumf %27, %28 : vector<8x128xf32>
    %cst_7 = arith.constant 1.000000e+00 : f32
    %30 = vector.broadcast %cst_7 : f32 to vector<8x128xf32>
    %31 = arith.subf %30, %24 : vector<8x128xf32>
    %32 = math.log %31 : vector<8x128xf32>
    %cst_8 = arith.constant -1.000000e+02 : f32
    %33 = vector.broadcast %cst_8 : f32 to vector<8x128xf32>
    %34 = arith.maximumf %32, %33 : vector<8x128xf32>
    %35 = arith.subf %29, %34 : vector<8x128xf32>
    %36 = arith.mulf %26, %35 : vector<8x128xf32>
    %37 = arith.addf %36, %34 : vector<8x128xf32>
    %cst_9 = arith.constant 0.000000e+00 : f32
    %38 = vector.broadcast %cst_9 : f32 to vector<8x128xf32>
    %39 = arith.subf %38, %37 : vector<8x128xf32>
    %40 = arith.addf %10, %39 : vector<8x128xf32>
    %41 = arith.mulf %24, %26 : vector<8x128xf32>
    %42 = arith.addf %10, %41 : vector<8x128xf32>
    %43 = arith.addf %24, %26 : vector<8x128xf32>
    %44 = arith.addf %10, %43 : vector<8x128xf32>
    %c1_i32 = arith.constant 1 : i32
    %c8_i32_10 = arith.constant 8 : i32
    %45 = arith.muli %c1_i32, %c8_i32_10 : i32
    %46 = tpu.assume_multiple %45, 8 : i32
    %47 = arith.index_cast %46 : i32 to index
    %c0_11 = arith.constant 0 : index
    %48 = vector.load %arg2[%47, %c0_11] : memref<16x128xf32, #tpu.memory_space<vmem>>, vector<8x128xf32>
    %49 = arith.index_cast %46 : i32 to index
    %c0_12 = arith.constant 0 : index
    %50 = vector.load %arg3[%49, %c0_12] : memref<16x128xf32, #tpu.memory_space<vmem>>, vector<8x128xf32>
    %c1024_i32_13 = arith.constant 1024 : i32
    %51 = arith.muli %c1_i32, %c1024_i32_13 : i32
    %52 = arith.addi %4, %51 : i32
    %53 = vector.broadcast %52 : i32 to vector<8x128xi32>
    %54 = arith.addi %53, %9 : vector<8x128xi32>
    %55 = vector.broadcast %3 : i32 to vector<8x128xi32>
    %56 = arith.cmpi slt, %54, %55 : vector<8x128xi32>
    %cst_14 = arith.constant 0.000000e+00 : f32
    %57 = vector.broadcast %cst_14 : f32 to vector<8x128xf32>
    %58 = arith.select %56, %48, %57 : vector<8x128xi1>, vector<8x128xf32>
    %cst_15 = arith.constant 0.000000e+00 : f32
    %59 = vector.broadcast %cst_15 : f32 to vector<8x128xf32>
    %60 = arith.select %56, %50, %59 : vector<8x128xi1>, vector<8x128xf32>
    %61 = math.log %58 : vector<8x128xf32>
    %cst_16 = arith.constant -1.000000e+02 : f32
    %62 = vector.broadcast %cst_16 : f32 to vector<8x128xf32>
    %63 = arith.maximumf %61, %62 : vector<8x128xf32>
    %cst_17 = arith.constant 1.000000e+00 : f32
    %64 = vector.broadcast %cst_17 : f32 to vector<8x128xf32>
    %65 = arith.subf %64, %58 : vector<8x128xf32>
    %66 = math.log %65 : vector<8x128xf32>
    %cst_18 = arith.constant -1.000000e+02 : f32
    %67 = vector.broadcast %cst_18 : f32 to vector<8x128xf32>
    %68 = arith.maximumf %66, %67 : vector<8x128xf32>
    %69 = arith.subf %63, %68 : vector<8x128xf32>
    %70 = arith.mulf %60, %69 : vector<8x128xf32>
    %71 = arith.addf %70, %68 : vector<8x128xf32>
    %cst_19 = arith.constant 0.000000e+00 : f32
    %72 = vector.broadcast %cst_19 : f32 to vector<8x128xf32>
    %73 = arith.subf %72, %71 : vector<8x128xf32>
    %74 = arith.addf %40, %73 : vector<8x128xf32>
    %75 = arith.mulf %58, %60 : vector<8x128xf32>
    %76 = arith.addf %42, %75 : vector<8x128xf32>
    %77 = arith.addf %58, %60 : vector<8x128xf32>
    %78 = arith.addf %44, %77 : vector<8x128xf32>
    %c2_i32 = arith.constant 2 : i32
    %c0_20 = arith.constant 0 : index
    %c0_21 = arith.constant 0 : index
    %79 = vector.load %arg4[%c0_20, %c0_21] : memref<24x128xf32, #tpu.memory_space<vmem>>, vector<8x128xf32>
    %80 = arith.addf %79, %74 : vector<8x128xf32>
    %c0_22 = arith.constant 0 : index
    %c0_23 = arith.constant 0 : index
    %81 = vector.load %arg4[%c0_22, %c0_23] : memref<24x128xf32, #tpu.memory_space<vmem>>, vector<8x128xf32>
    tpu.vector_store %arg4[%c0_22, %c0_23], %80 {strides = array<i32>} : memref<24x128xf32, #tpu.memory_space<vmem>>, vector<8x128xf32>,
    %c8 = arith.constant 8 : index
    %c0_24 = arith.constant 0 : index
    %82 = vector.load %arg4[%c8, %c0_24] : memref<24x128xf32, #tpu.memory_space<vmem>>, vector<8x128xf32>
    %83 = arith.addf %82, %76 : vector<8x128xf32>
    %c8_25 = arith.constant 8 : index
    %c0_26 = arith.constant 0 : index
    %84 = vector.load %arg4[%c8_25, %c0_26] : memref<24x128xf32, #tpu.memory_space<vmem>>, vector<8x128xf32>
    tpu.vector_store %arg4[%c8_25, %c0_26], %83 {strides = array<i32>} : memref<24x128xf32, #tpu.memory_space<vmem>>, vector<8x128xf32>,
    %c16 = arith.constant 16 : index
    %c0_27 = arith.constant 0 : index
    %85 = vector.load %arg4[%c16, %c0_27] : memref<24x128xf32, #tpu.memory_space<vmem>>, vector<8x128xf32>
    %86 = arith.addf %85, %78 : vector<8x128xf32>
    %c16_28 = arith.constant 16 : index
    %c0_29 = arith.constant 0 : index
    %87 = vector.load %arg4[%c16_28, %c0_29] : memref<24x128xf32, #tpu.memory_space<vmem>>, vector<8x128xf32>
    tpu.vector_store %arg4[%c16_28, %c0_29], %86 {strides = array<i32>} : memref<24x128xf32, #tpu.memory_space<vmem>>, vector<8x128xf32>,
    return
  }
  func.func @transform_0(%arg0: i32, %arg1: memref<1xi32, #tpu.memory_space<smem>>) -> (i32, i32) {
    %c0_i32 = arith.constant 0 : i32
    %c0_i32_0 = arith.constant 0 : i32
    return %arg0, %c0_i32 : i32, i32
  }
  func.func @transform_1(%arg0: i32, %arg1: memref<1xi32, #tpu.memory_space<smem>>) -> (i32, i32) {
    %c0_i32 = arith.constant 0 : i32
    %c0_i32_0 = arith.constant 0 : i32
    return %arg0, %c0_i32 : i32, i32
  }
  func.func @transform_2(%arg0: i32, %arg1: memref<1xi32, #tpu.memory_space<smem>>) -> (i32, i32) {
    %c0_i32 = arith.constant 0 : i32
    %c0_i32_0 = arith.constant 0 : i32
    %c0_i32_1 = arith.constant 0 : i32
    return %c0_i32, %c0_i32_0 : i32, i32
  }
}

</mosaic_0001>

<bundles_post_ra>
// kernel: tpu_custom_call.1
= control target key start
LH: loop header
LB: loop body
LE: loop exit
PB: predicated region body
PF: predicated region fallthrough
CT: control target
= control target key end

     0   :  { %9 = vsyncpa [#allocation5], 0  ;;  %s260_s0 = inlined_call_operand.<no memory space> [shape: s32[1], index: 0, kind: input, shape index: {}]   ;;  %s261_s1 = inlined_call_operand.hbm [shape: f32[16,128], index: 1, kind: input, shape index: {}]   ;;  %s262_s2 = inlined_call_operand.hbm [shape: f32[16,128], index: 2, kind: input, shape index: {}]   ;;  %s263_s3 = inlined_call_operand.hbm [shape: f32[24,128], index: 3, kind: output, shape index: {}]  }
   0x1   :  { %10 = vsyncpa [#allocation8], 0 }
   0x2   :  { %11 = vsyncpa [#allocation6], 0  ;;  %s214_s12 = smov [#allocation4]  }
   0x3   :  { %s17_s13 = sshll.u32 %s214_s12, 4  ;;  %s18_s13 = int_to_ptr.vmem [resolvable:$true] %s17_s13 }
   0x4   :  { %s156_s14 = scalar_lea.vmem %s18_s13, 256  ;;  %p161_p1 = scmp.lt.s32.totalorder %s18_s13, %s18_s13 }
   0x5   :  { %p157_p0 = scmp.ne.s32.totalorder %s18_s13, %s156_s14  ;;  %p162_p2 = scmp.lt.s32.totalorder %s156_s14, %s156_s14 }
   0x7   :  { %p163_p3 = por %p162_p2, %p161_p1 }
   0x9   :  { %p164_p4 = pnand %p163_p3, %p157_p0 }
   0xb   :  { %167 = shalt.err (!%p164_p4)
}
   0xc   :  { %s215_s15 = smov 128   ;;  %s216_s16 = smov 8  }
   0xd   :  { %23 = dma.hbm_to_vmem [thread:$0]  %s261_s1, 256, %s18_s13, [#allocation5], %s215_s15, %s215_s15, %s216_s16  }
   0xe   :  { %s217_s19 = smov [#allocation7]  }
   0xf   :  { %s29_s20 = sshll.u32 %s217_s19, 4  ;;  %s30_s20 = int_to_ptr.vmem [resolvable:$true] %s29_s20 }
  0x10   :  { %s176_s21 = scalar_lea.vmem %s30_s20, 256  ;;  %p181_p6 = scmp.lt.s32.totalorder %s30_s20, %s30_s20 }
  0x11   :  { %p177_p5 = scmp.ne.s32.totalorder %s30_s20, %s176_s21  ;;  %p182_p7 = scmp.lt.s32.totalorder %s176_s21, %s176_s21 }
  0x13   :  { %p183_p8 = por %p182_p7, %p181_p6 }
  0x15   :  { %p184_p9 = pnand %p183_p8, %p177_p5 }
  0x17   :  { %187 = shalt.err (!%p184_p9)
}
  0x18   :  { %35 = dma.hbm_to_vmem [thread:$0]  %s262_s2, 256, %s30_s20, [#allocation8], %s215_s15, %s215_s15, %s216_s16  }
  0x19   :  { %208 = dma.done.wait [#allocation5], 256  }
  0x1a   :  { %209 = vsyncadd [#allocation5], 4294967040 }
  0x1b   :  { %210 = dma.done.wait [#allocation8], 256  }
  0x1c   :  { %211 = vsyncadd [#allocation8], 4294967040  ;;  %v51_v0 = vlaneseq  ;;  %v61_v4 = vstv %s260_s0  ;;  %v57_v6 = vld [vmem:[#allocation4] sm:$0xff]  ;;  %v58_v7 = vld [vmem:[#allocation7] sm:$0xff]  ;;  %s218_s0 = smov [#allocation9]  }
  0x1d   :  { %v82_v8 = vld [vmem:[#allocation4 + $0x8] sm:$0xff]  ;;  %v84_v9 = vld [vmem:[#allocation7 + $0x8] sm:$0xff]  ;;  %s121_s2 = sshll.u32 %s218_s0, 4  ;;  %s122_s2 = int_to_ptr.vmem [resolvable:$true] %s121_s2 }
  0x1e   :  { %v52_v1 = vshrl.u32 %v51_v0, 7  ;;  %v54_v2 = vand.u32 127, %v51_v0  ;;  %s188_s25 = scalar_lea.vmem %s122_s2, 384  ;;  %p193_p11 = scmp.lt.s32.totalorder %s122_s2, %s122_s2 }
  0x1f   :  { %p189_p10 = scmp.ne.s32.totalorder %s122_s2, %s188_s25  ;;  %p194_p12 = scmp.lt.s32.totalorder %s188_s25, %s188_s25 }
  0x20   :  { %v55_v3 = vmul.u32 128, %v52_v1 }
  0x21   :  { %p195_p13 = por %p194_p12, %p193_p11 }
  0x22   :  { %v56_v5 = vadd.s32 %v55_v3, %v54_v2 }
  0x23   :  { %p196_p0 = pnand %p195_p13, %p189_p10 }
  0x24   :  { %vm62_vm0 = vcmp.lt.s32.totalorder %v56_v5, %v61_v4  ;;  %v87_v10 = vadd.s32 1024, %v56_v5 }
  0x25   :  { %v63_v11 = vsel %vm62_vm0, %v57_v6, 0.0  ;;  %v64_v12 = vsel %vm62_vm0, %v58_v7, 0.0 }
  0x26   :  { %140 = vlog2.f32 %v63_v11  ;;  %v68_v13 = vsub.f32 1.0, %v63_v11  ;;  %vm88_vm1 = vcmp.lt.s32.totalorder %v87_v10, %v61_v4  ;;  %v77_v14 = vmul.f32 %v64_v12, %v63_v11 }
  0x27   :  { %v89_v15 = vsel %vm88_vm1, %v82_v8, 0.0  ;;  %v90_v16 = vsel %vm88_vm1, %v84_v9, 0.0  ;;  %v79_v17 = vadd.f32 %v64_v12, %v63_v11 }
  0x28   :  { %142 = vlog2.f32 %v68_v13  ;;  %v94_v18 = vsub.f32 1.0, %v89_v15  ;;  %v103_v19 = vmul.f32 %v90_v16, %v89_v15  ;;  %v105_v20 = vadd.f32 %v90_v16, %v89_v15 }
  0x29   :  { %144 = vlog2.f32 %v89_v15 }
  0x2a   :  { %146 = vlog2.f32 %v94_v18  ;;  %v104_v21 = vadd.f32 %v103_v19, %v77_v14  ;;  %v106_v22 = vadd.f32 %v105_v20, %v79_v17 }
  0x2c   :  { %112 = vst [vmem:[#allocation9 + $0x8] sm:$0xff] %v104_v21  ;;  %115 = vst [vmem:[#allocation9 + $0x10] sm:$0xff] %v106_v22 }
  0x33   :  { %v141_v23 = vpop.eup %140 }
  0x34   :  { %v66_v24 = vmul.f32 0.6931472, %v141_v23 }
  0x35   :  { %v143_v25 = vpop.eup %142 }
  0x36   :  { %v145_v26 = vpop.eup %144  ;;  %v67_v27 = vmax.f32 %v66_v24, -100.0  ;;  %v70_v28 = vmul.f32 0.6931472, %v143_v25 }
  0x37   :  { %v147_v29 = vpop.eup %146  ;;  %v92_v30 = vmul.f32 0.6931472, %v145_v26 }
  0x38   :  { %v71_v31 = vmax.f32 %v70_v28, -100.0  ;;  %v96_v32 = vmul.f32 0.6931472, %v147_v29 }
  0x39   :  { %v93_v33 = vmax.f32 %v92_v30, -100.0 }
  0x3a   :  { %v72_v34 = vsub.f32 %v67_v27, %v71_v31  ;;  %v97_v35 = vmax.f32 %v96_v32, -100.0 }
  0x3c   :  { %v73_v36 = vmul.f32 %v72_v34, %v64_v12  ;;  %v98_v37 = vsub.f32 %v93_v33, %v97_v35 }
  0x3e   :  { %v74_v38 = vadd.f32 %v73_v36, %v71_v31  ;;  %v99_v39 = vmul.f32 %v98_v37, %v90_v16 }
  0x40   :  { %v75_v40 = vsub.f32 0.0, %v74_v38  ;;  %v100_v41 = vadd.f32 %v99_v39, %v97_v35 }
  0x42   :  { %v101_v42 = vsub.f32 0.0, %v100_v41 }
  0x44   :  { %v102_v43 = vadd.f32 %v101_v42, %v75_v40 }
  0x46   :  { %109 = vst [vmem:[#allocation9] sm:$0xff] %v102_v43 }
  0x47   :  { %199 = shalt.err (!%p196_p0)
}
  0x48   :  { %127 = dma.vmem_to_hbm [thread:$0]  %s122_s2, 384, %s263_s3, [#allocation6], %s215_s15, %s215_s15, %s216_s16  }
  0x49   :  { %212 = dma.done.wait [#allocation6], 384  }
  0x4a   :  { %213 = vsyncadd [#allocation6], 4294966912 }
  0x4b   :  { %131 = vsyncpa [#allocation5], 1 }
  0x4c   :  { %132 = vsyncpa [#allocation8], 1 }
  0x4d   :  { %133 = vsyncpa [#allocation6], 1 }

</bundles_post_ra>
